<compile_context>
chip_gen: v5e
topology: v5e:2x2
jax: 0.10.0
libtpu: 0.0.40
codegen_flags: <defaults>
</compile_context>

<pallas_src>
import math
import jax
import jax.numpy as jnp
from jax import lax
from jax.experimental import pallas as pl
from jax.experimental.pallas import tpu as pltpu


# ----------------------------------------------------------------------------
# Helpers
# ----------------------------------------------------------------------------
def _round_up(x, m):
    return ((x + m - 1) // m) * m


def _divisor_tile(dim, cap):
    """Largest multiple of 128 that is <= cap and divides `dim` (dim % 128 == 0)."""
    t = min(cap, dim)
    t -= t % 128
    t = max(t, 128)
    while dim % t != 0:
        t -= 128
    return t


def _pick_tiles(B, Np, Kp, tm_cap, tn_cap, tk_cap):
    """Choose (tm, tn, tk, Mp) with minimal batch padding and v7x 2-core work."""
    # tm: multiple of 16 (bf16 sublane packing); never pad B up to a full
    # default tile.  For B > tm_cap, waste < one sublane group per M tile.
    if B <= tm_cap:
        tm = _round_up(B, 16)
    else:
        n_m = -(-B // tm_cap)                      # number of M tiles
        tm = _round_up(-(-B // n_m), 16)
    Mp = _round_up(B, tm)
    grid_m = Mp // tm

    tk = _divisor_tile(Kp, tk_cap)
    tn = _divisor_tile(Np, tn_cap)
    # v7x megacore: if the M axis has a single tile, make sure the N axis has
    # at least two so both TensorCores get work.
    if grid_m == 1 and Np // tn < 2 and Np >= 256 and (Np // 2) % 128 == 0:
        tn = _divisor_tile(Np, Np // 2)
    return tm, tn, tk, Mp


# ----------------------------------------------------------------------------
# Kernels
# ----------------------------------------------------------------------------
def _noisy_linear_train_kernel(x_ref, wmu_ref, wsig_ref, eps_out_ref,
                               eps_in_ref, b_ref, o_ref, acc_ref):
    """One (tm, tn, tk) grid step of y = x @ (mu + sig*(eps_out⊗eps_in)).T + b."""
    @pl.when(pl.program_id(2) == 0)
    def _():
        acc_ref[...] = jnp.zeros_like(acc_ref)

    # Factorized noise combined on-chip.  FMA is done in f32 on the VPU (v5e
    # has no bf16 VALU); the combined tile is cast back to the compute dtype
    # (bf16) so the MXU runs in its fast native mode.
    eps = eps_out_ref[...] * eps_in_ref[...]                 # (tn, tk) f32
    w32 = (wmu_ref[...].astype(jnp.float32)
           + wsig_ref[...].astype(jnp.float32) * eps)
    w = w32.astype(x_ref.dtype)

    # x:(tm,tk) contracted with w:(tn,tk) over K -> (tm,tn). No transpose formed.
    acc_ref[...] += lax.dot_general(
        x_ref[...], w,
        dimension_numbers=(((1,), (1,)), ((), ())),
        preferred_element_type=jnp.float32)

    @pl.when(pl.program_id(2) == pl.num_programs(2) - 1)
    def _():
        o_ref[...] = (acc_ref[...] + b_ref[...]).astype(o_ref.dtype)


def _linear_eval_kernel(x_ref, wmu_ref, b_ref, o_ref, acc_ref):
    """Eval path: plain y = x @ weight_mu.T + bias_mu (mu-only HBM traffic)."""
    @pl.when(pl.program_id(2) == 0)
    def _():
        acc_ref[...] = jnp.zeros_like(acc_ref)

    acc_ref[...] += lax.dot_general(
        x_ref[...], wmu_ref[...],
        dimension_numbers=(((1,), (1,)), ((), ())),
        preferred_element_type=jnp.float32)

    @pl.when(pl.program_id(2) == pl.num_programs(2) - 1)
    def _():
        o_ref[...] = (acc_ref[...] + b_ref[...]).astype(o_ref.dtype)


# ----------------------------------------------------------------------------
# Wrappers
# ----------------------------------------------------------------------------
def noisy_linear(x, p, *, training=True, tm=256, tn=512, tk=1024):
    """Pallas NoisyLinear forward.

    x: (B, in_features) array (any float dtype).
    p: dict from `prepare_noisy_linear_params` (pre-padded, bf16 weights).
    Returns (B, out_features) in x.dtype.
    """
    B, K = x.shape
    assert K == p["in_features"], "in_features mismatch"
    N, Np, Kp = p["out_features"], p["Np"], p["Kp"]
    cdt = p["compute_dtype"]

    tm, tn, tk, Mp = _pick_tiles(B, Np, Kp, tm, tn, tk)

    # Only x (cheap, has to be touched anyway) and the tiny bias are padded
    # per call; weights were padded once in prepare_noisy_linear_params.
    xp = jnp.pad(x.astype(cdt), ((0, Mp - B), (0, Kp - K)))

    if training:
        b_eff = p["bias_mu"] + p["bias_sigma"] * p["bias_epsilon"]
    else:
        b_eff = p["bias_mu"]
    b_p = jnp.pad(b_eff, (0, Np - N)).reshape(1, Np)          # f32, tiny

    grid = (Mp // tm, Np // tn, Kp // tk)
    x_spec = pl.BlockSpec((tm, tk), lambda i, j, k: (i, k))
    w_spec = pl.BlockSpec((tn, tk), lambda i, j, k: (j, k))
    b_spec = pl.BlockSpec((1, tn), lambda i, j, k: (0, j))
    o_spec = pl.BlockSpec((tm, tn), lambda i, j, k: (i, j))

    cparams = pltpu.CompilerParams(
        dimension_semantics=("parallel", "parallel", "arbitrary"))

    out_shape = jax.ShapeDtypeStruct((Mp, Np), x.dtype)
    scratch = [pltpu.VMEM((tm, tn), jnp.float32)]

    if training:
        ein_spec = pl.BlockSpec((1, tk), lambda i, j, k: (0, k))
        eout_spec = pl.BlockSpec((tn, 1), lambda i, j, k: (j, 0))
        out = pl.pallas_call(
            _noisy_linear_train_kernel,
            out_shape=out_shape,
            grid=grid,
            in_specs=[x_spec, w_spec, w_spec, eout_spec, ein_spec, b_spec],
            out_specs=o_spec,
            scratch_shapes=scratch,
            compiler_params=cparams,
        )(xp, p["weight_mu"], p["weight_sigma"], p["eps_out"], p["eps_in"], b_p)
    else:
        out = pl.pallas_call(
            _linear_eval_kernel,
            out_shape=out_shape,
            grid=grid,
            in_specs=[x_spec, w_spec, b_spec],
            out_specs=o_spec,
            scratch_shapes=scratch,
            compiler_params=cparams,
        )(xp, p["weight_mu"], b_p)

    return out[:B, :N]


def _scale_noise(key, size):
    # x = randn(size); x = sign(x) * sqrt(|x|)
    x = jax.random.normal(key, (size,), dtype=jnp.float32)
    return jnp.sign(x) * jnp.sqrt(jnp.abs(x))


def init_noisy_linear_params(key, in_features, out_features, std_init=0.4):
    """Raw f32 parameters matching NoisyLinear.reset_parameters / reset_noise.

    Noise is kept factorized (eps_in, eps_out); weight_epsilon = eps_out ⊗ eps_in
    is formed on-chip inside the kernel instead of being materialized in HBM.
    """
    k_wmu, k_bmu, k_ein, k_eout, k_beps = jax.random.split(key, 5)
    mu_range = 1.0 / math.sqrt(in_features)

    weight_mu = jax.random.uniform(
        k_wmu, (out_features, in_features), dtype=jnp.float32,
        minval=-mu_range, maxval=mu_range)
    weight_sigma = jnp.full((out_features, in_features),
                            std_init / math.sqrt(in_features), dtype=jnp.float32)
    bias_mu = jax.random.uniform(
        k_bmu, (out_features,), dtype=jnp.float32,
        minval=-mu_range, maxval=mu_range)
    bias_sigma = jnp.full((out_features,),
                          std_init / math.sqrt(out_features), dtype=jnp.float32)

    eps_in = _scale_noise(k_ein, in_features)
    eps_out = _scale_noise(k_eout, out_features)
    bias_epsilon = _scale_noise(k_beps, out_features)

    return dict(weight_mu=weight_mu, weight_sigma=weight_sigma,
                eps_in=eps_in, eps_out=eps_out,
                bias_mu=bias_mu, bias_sigma=bias_sigma,
                bias_epsilon=bias_epsilon)


def prepare_noisy_linear_params(raw, *, compute_dtype=jnp.bfloat16):
    """Pad (to 128 multiples) and cast the large parameters ONCE.

    This removes the per-forward full-weight jnp.pad (a whole extra HBM
    read+write of the weights) and lets the kernel stream bf16 weights.
    """
    N, K = raw["weight_mu"].shape
    Np, Kp = _round_up(N, 128), _round_up(K, 128)

    def pad2(a):
        return jnp.pad(a, ((0, Np - N), (0, Kp - K)))

    return dict(
        in_features=K, out_features=N, Np=Np, Kp=Kp,
        compute_dtype=compute_dtype,
        weight_mu=pad2(raw["weight_mu"]).astype(compute_dtype),
        weight_sigma=pad2(raw["weight_sigma"]).astype(compute_dtype),
        # Noise vectors stay f32 (tiny) so the on-chip FMA is full precision.
        eps_in=jnp.pad(raw["eps_in"], (0, Kp - K)).astype(jnp.float32).reshape(1, Kp),
        eps_out=jnp.pad(raw["eps_out"], (0, Np - N)).astype(jnp.float32).reshape(Np, 1),
        bias_mu=raw["bias_mu"].astype(jnp.float32),
        bias_sigma=raw["bias_sigma"].astype(jnp.float32),
        bias_epsilon=raw["bias_epsilon"].astype(jnp.float32),
    )


if __name__ == "__main__":
    key = jax.random.PRNGKey(0)
    k_params, k_x = jax.random.split(key)

    batch, in_features, out_features = 8, 32, 64
    raw = init_noisy_linear_params(k_params, in_features, out_features)
    params = prepare_noisy_linear_params(raw)          # bf16, padded once
    x = jax.random.normal(k_x, (batch, in_features), dtype=jnp.float32)

    # Training path (noisy weights) and eval path (mu-only).
    y = noisy_linear(x, params, training=True)
    y_eval = noisy_linear(x, params, training=False)
    jax.block_until_ready((y, y_eval))

    # --- Reference with the SAME bf16 quantization the kernel uses (tight). ---
    f32 = jnp.float32
    bf = jnp.bfloat16
    wmu_q = raw["weight_mu"].astype(bf).astype(f32)
    wsig_q = raw["weight_sigma"].astype(bf).astype(f32)
    x_q = x.astype(bf).astype(f32)
    w_eps = jnp.outer(raw["eps_out"], raw["eps_in"])
    w_eff_q = (wmu_q + wsig_q * w_eps).astype(bf).astype(f32)
    b_eff = raw["bias_mu"] + raw["bias_sigma"] * raw["bias_epsilon"]
    y_ref = jnp.dot(x_q, w_eff_q.T, precision=lax.Precision.HIGHEST) + b_eff
    y_eval_ref = jnp.dot(x_q, wmu_q.T,
                         precision=lax.Precision.HIGHEST) + raw["bias_mu"]

    # --- Full-f32 module reference (loose: bf16 streaming tolerance). ---
    w_eff_f32 = raw["weight_mu"] + raw["weight_sigma"] * w_eps
    y_ref_f32 = jnp.dot(x, w_eff_f32.T, precision=lax.Precision.HIGHEST) + b_eff

    assert y.shape == (batch, out_features)
    assert y_eval.shape == (batch, out_features)
    assert jnp.allclose(y, y_ref, atol=2e-3, rtol=2e-3)
    assert jnp.allclose(y_eval, y_eval_ref, atol=2e-3, rtol=2e-3)
    assert jnp.allclose(y, y_ref_f32, atol=5e-2, rtol=5e-2)

    print("KERNEL_OK")
</pallas_src>

<mosaic_0001>
module attributes {stable_mosaic.version = 11 : i64} {
  func.func @_noisy_linear_train_kernel(%arg0: i32, %arg1: i32, %arg2: i32, %arg3: memref<16x128xbf16, #tpu.memory_space<vmem>>, %arg4: memref<128x128xbf16, #tpu.memory_space<vmem>>, %arg5: memref<128x128xbf16, #tpu.memory_space<vmem>>, %arg6: memref<128x1xf32, #tpu.memory_space<vmem>>, %arg7: memref<1x128xf32, #tpu.memory_space<vmem>>, %arg8: memref<1x128xf32, #tpu.memory_space<vmem>>, %arg9: memref<16x128xf32, #tpu.memory_space<vmem>>, %arg10: memref<16x128xf32, #tpu.memory_space<vmem>>) attributes {dimension_semantics = [#tpu.dimension_semantics<parallel>, #tpu.dimension_semantics<parallel>, #tpu.dimension_semantics<arbitrary>], iteration_bounds = array<i64: 1, 1, 1>, scalar_prefetch = 0 : i64, scratch_operands = 1 : i64, tpu.core_type = #tpu.core_type<tc>, window_params = [{transform_indices = @transform_0, window_bounds = array<i64: 16, 128>}, {transform_indices = @transform_1, window_bounds = array<i64: 128, 128>}, {transform_indices = @transform_2, window_bounds = array<i64: 128, 128>}, {transform_indices = @transform_3, window_bounds = array<i64: 128, 1>}, {transform_indices = @transform_4, window_bounds = array<i64: 1, 128>}, {transform_indices = @transform_5, window_bounds = array<i64: 1, 128>}, {transform_indices = @transform_6, window_bounds = array<i64: 16, 128>}]} {
    %c0_i32 = arith.constant 0 : i32
    %0 = arith.cmpi eq, %arg2, %c0_i32 : i32
    %1 = arith.extui %0 : i1 to i32
    %c0_i32_0 = arith.constant 0 : i32
    %2 = arith.cmpi ne, %1, %c0_i32_0 : i32
    scf.if %2 {
      %cst_16 = arith.constant 0.000000e+00 : f32
      %23 = vector.broadcast %cst_16 : f32 to vector<16x128xf32>
      %c0_17 = arith.constant 0 : index
      %c0_18 = arith.constant 0 : index
      %24 = vector.load %arg10[%c0_17, %c0_18] : memref<16x128xf32, #tpu.memory_space<vmem>>, vector<16x128xf32>
      tpu.vector_store %arg10[%c0_17, %c0_18], %23 {strides = array<i32>} : memref<16x128xf32, #tpu.memory_space<vmem>>, vector<16x128xf32>,
    } else {
    }
    %c0 = arith.constant 0 : index
    %c0_1 = arith.constant 0 : index
    %3 = vector.load %arg6[%c0, %c0_1] : memref<128x1xf32, #tpu.memory_space<vmem>>, vector<128x1xf32>
    %c0_2 = arith.constant 0 : index
    %c0_3 = arith.constant 0 : index
    %4 = vector.load %arg7[%c0_2, %c0_3] : memref<1x128xf32, #tpu.memory_space<vmem>>, vector<1x128xf32>
    %5 = vector.broadcast %3 : vector<128x1xf32> to vector<128x128xf32>
    %6 = vector.broadcast %4 : vector<1x128xf32> to vector<128x128xf32>
    %7 = arith.mulf %5, %6 : vector<128x128xf32>
    %c0_4 = arith.constant 0 : index
    %c0_5 = arith.constant 0 : index
    %8 = vector.load %arg4[%c0_4, %c0_5] : memref<128x128xbf16, #tpu.memory_space<vmem>>, vector<128x128xbf16>
    %9 = arith.extf %8 : vector<128x128xbf16> to vector<128x128xf32>
    %c0_6 = arith.constant 0 : index
    %c0_7 = arith.constant 0 : index
    %10 = vector.load %arg5[%c0_6, %c0_7] : memref<128x128xbf16, #tpu.memory_space<vmem>>, vector<128x128xbf16>
    %11 = arith.extf %10 : vector<128x128xbf16> to vector<128x128xf32>
    %12 = arith.mulf %11, %7 : vector<128x128xf32>
    %13 = arith.addf %9, %12 : vector<128x128xf32>
    %14 = arith.truncf %13 : vector<128x128xf32> to vector<128x128xbf16>
    %c0_8 = arith.constant 0 : index
    %c0_9 = arith.constant 0 : index
    %15 = vector.load %arg10[%c0_8, %c0_9] : memref<16x128xf32, #tpu.memory_space<vmem>>, vector<16x128xf32>
    %c0_10 = arith.constant 0 : index
    %c0_11 = arith.constant 0 : index
    %16 = vector.load %arg3[%c0_10, %c0_11] : memref<16x128xbf16, #tpu.memory_space<vmem>>, vector<16x128xbf16>
    %cst = arith.constant dense<0.000000e+00> : vector<16x128xf32>
    %17 = tpu.matmul %16, %14, %cst {dimension_numbers = #tpu.dot_dimension_numbers<[1], [1], [0], [0], [0, 0, 1, 0], [], []>} : vector<16x128xbf16>, vector<128x128xbf16>, vector<16x128xf32> -> vector<16x128xf32>
    %18 = arith.addf %15, %17 : vector<16x128xf32>
    %c0_12 = arith.constant 0 : index
    %c0_13 = arith.constant 0 : index
    %19 = vector.load %arg10[%c0_12, %c0_13] : memref<16x128xf32, #tpu.memory_space<vmem>>, vector<16x128xf32>
    tpu.vector_store %arg10[%c0_12, %c0_13], %18 {strides = array<i32>} : memref<16x128xf32, #tpu.memory_space<vmem>>, vector<16x128xf32>,
    %c0_i32_14 = arith.constant 0 : i32
    %20 = arith.cmpi eq, %arg2, %c0_i32_14 : i32
    %21 = arith.extui %20 : i1 to i32
    %c0_i32_15 = arith.constant 0 : i32
    %22 = arith.cmpi ne, %21, %c0_i32_15 : i32
    scf.if %22 {
      %c0_16 = arith.constant 0 : index
      %c0_17 = arith.constant 0 : index
      %23 = vector.load %arg10[%c0_16, %c0_17] : memref<16x128xf32, #tpu.memory_space<vmem>>, vector<16x128xf32>
      %c0_18 = arith.constant 0 : index
      %c0_19 = arith.constant 0 : index
      %24 = vector.load %arg8[%c0_18, %c0_19] : memref<1x128xf32, #tpu.memory_space<vmem>>, vector<1x128xf32>
      %25 = vector.broadcast %24 : vector<1x128xf32> to vector<16x128xf32>
      %26 = arith.addf %23, %25 : vector<16x128xf32>
      %c0_20 = arith.constant 0 : index
      %c0_21 = arith.constant 0 : index
      %27 = vector.load %arg9[%c0_20, %c0_21] : memref<16x128xf32, #tpu.memory_space<vmem>>, vector<16x128xf32>
      tpu.vector_store %arg9[%c0_20, %c0_21], %26 {strides = array<i32>} : memref<16x128xf32, #tpu.memory_space<vmem>>, vector<16x128xf32>,
    } else {
    }
    return
  }
  func.func @transform_0(%arg0: i32, %arg1: i32, %arg2: i32) -> (i32, i32) {
    %c0_i32 = arith.constant 0 : i32
    return %arg0, %arg2 : i32, i32
  }
  func.func @transform_1(%arg0: i32, %arg1: i32, %arg2: i32) -> (i32, i32) {
    %c0_i32 = arith.constant 0 : i32
    return %arg1, %arg2 : i32, i32
  }
  func.func @transform_2(%arg0: i32, %arg1: i32, %arg2: i32) -> (i32, i32) {
    %c0_i32 = arith.constant 0 : i32
    return %arg1, %arg2 : i32, i32
  }
  func.func @transform_3(%arg0: i32, %arg1: i32, %arg2: i32) -> (i32, i32) {
    %c0_i32 = arith.constant 0 : i32
    %c0_i32_0 = arith.constant 0 : i32
    return %arg1, %c0_i32 : i32, i32
  }
  func.func @transform_4(%arg0: i32, %arg1: i32, %arg2: i32) -> (i32, i32) {
    %c0_i32 = arith.constant 0 : i32
    %c0_i32_0 = arith.constant 0 : i32
    return %c0_i32, %arg2 : i32, i32
  }
  func.func @transform_5(%arg0: i32, %arg1: i32, %arg2: i32) -> (i32, i32) {
    %c0_i32 = arith.constant 0 : i32
    %c0_i32_0 = arith.constant 0 : i32
    return %c0_i32, %arg1 : i32, i32
  }
  func.func @transform_6(%arg0: i32, %arg1: i32, %arg2: i32) -> (i32, i32) {
    %c0_i32 = arith.constant 0 : i32
    return %arg0, %arg1 : i32, i32
  }
}

</mosaic_0001>

<bundles_post_ra>
// kernel: tpu_custom_call.1
= control target key start
LH: loop header
LB: loop body
LE: loop exit
PB: predicated region body
PF: predicated region fallthrough
CT: control target
= control target key end

     0   :  { %11 = vsyncpa [#allocation4], 0  ;;  %s641_s0 = inlined_call_operand.hbm [shape: bf16[16,128], index: 0, kind: input, shape index: {}]   ;;  %s642_s1 = inlined_call_operand.vmem [shape: bf16[128,128], index: 1, kind: input, shape index: {}]   ;;  %s643_s2 = inlined_call_operand.vmem [shape: bf16[128,128], index: 2, kind: input, shape index: {}]   ;;  %s644_s3 = inlined_call_operand.vmem [shape: f32[128,1], index: 3, kind: input, shape index: {}]   ;;  %s645_s4 = inlined_call_operand.vmem [shape: f32[1,128], index: 4, kind: input, shape index: {}]   ;;  %s646_s5 = inlined_call_operand.vmem [shape: f32[1,128], index: 5, kind: input, shape index: {}]   ;;  %s647_s6 = inlined_call_operand.hbm [shape: f32[16,128], index: 6, kind: output, shape index: {}]  }
   0x1   :  { %12 = vsyncpa [#allocation5], 0  ;;  %s17_s23 = sshll.u32 %s641_s0, 4  ;;  %s473_s24 = smov [#allocation3]   ;;  %s18_s23 = int_to_ptr.hbm [resolvable:$true] %s17_s23 }
   0x2   :  { %s19_s25 = sshll.u32 %s473_s24, 4  ;;  %s474_s26 = smov 64   ;;  %s20_s25 = int_to_ptr.vmem [resolvable:$true] %s19_s25 }
   0x3   :  { %s475_s27 = smov 4  }
   0x4   :  { %25 = dma.hbm_to_vmem [thread:$0]  %s18_s23, 128, %s20_s25, [#allocation4], %s474_s26, %s474_s26, %s475_s27  }
   0x5   :  { %469 = dma.done.wait [#allocation4], 128  }
   0x6   :  { %470 = vsyncadd [#allocation4], 4294967168  ;;  %v476_v0 = vmov 0   ;;  %v60_v1 = vld [vmem:[%s644_s3 + $0x70] sm:$0xff]  ;;  %v58_v2 = vld [vmem:[%s644_s3 + $0x60] sm:$0xff]  ;;  %s313_s19 = sshll.u32 %s647_s6, 4  ;;  %s314_s19 = int_to_ptr.hbm [resolvable:$true] %s313_s19 }
   0x7   :  { %417 = vset.pattern.permute.xlu1 %v476_v0  ;;  %416 = vset.pattern.permute.xlu0 %v476_v0  ;;  %v56_v3 = vld [vmem:[%s644_s3 + $0x50] sm:$0xff]  ;;  %v61_v4 = vld [vmem:[%s644_s3 + $0x78] sm:$0xff]  ;;  %v59_v5 = vld [vmem:[%s644_s3 + $0x68] sm:$0xff]  ;;  %s478_s20 = smov 128   ;;  %s479_s21 = smov 8  }
   0x8   :  { %418 = vset.pattern.permute.xlu2 %v476_v0  ;;  %135 = vperm.xlu0 %416, %v60_v1   ;;  %v57_v6 = vld [vmem:[%s644_s3 + $0x58] sm:$0xff]  ;;  %v55_v7 = vld [vmem:[%s644_s3 + $0x48] sm:$0xff]  ;;  %v54_v8 = vld [vmem:[%s644_s3 + $0x40] sm:$0xff] }
   0x9   :  { %125 = vperm.xlu1 %417, %v58_v2   ;;  %115 = vperm.xlu2 %418, %v56_v3   ;;  %v52_v9 = vld [vmem:[%s644_s3 + $0x30] sm:$0xff]  ;;  %v53_v10 = vld [vmem:[%s644_s3 + $0x38] sm:$0xff]  ;;  %v50_v11 = vld [vmem:[%s644_s3 + $0x20] sm:$0xff] }
   0xa   :  { %v51_v12 = vld [vmem:[%s644_s3 + $0x28] sm:$0xff]  ;;  %v49_v13 = vld [vmem:[%s644_s3 + $0x18] sm:$0xff]  ;;  %v48_v14 = vld [vmem:[%s644_s3 + $0x10] sm:$0xff] }
   0xb   :  { %v46_v15 = vld [vmem:[%s644_s3] sm:$0xff]  ;;  %v47_v16 = vld [vmem:[%s644_s3 + $0x8] sm:$0xff]  ;;  %v408_v20 = vld [vmem:[%s643_s2 + $0x38] sm:$0xff]  }
   0xc   :  { %v569_v19 = vld [vmem:[%s645_s4] ss:$0 sm:$0xff]  ;;  %v393_v21 = vunpack.c.l.bf16 %v408_v20  ;;  %v401_v23 = vld [vmem:[%s642_s1 + $0x38] sm:$0xff]   ;;  %v407_v25 = vld [vmem:[%s643_s2 + $0x30] sm:$0xff]   ;;  %v394_v26 = vunpack.c.h.bf16 %v408_v20 }
   0xd   :  { %v361_v31 = vunpack.c.l.bf16 %v401_v23  ;;  %v362_v32 = vunpack.c.h.bf16 %v401_v23  ;;  %v389_v33 = vunpack.c.l.bf16 %v407_v25  ;;  %v390_v36 = vunpack.c.h.bf16 %v407_v25  ;;  %v400_v38 = vld [vmem:[%s642_s1 + $0x30] sm:$0xff]   ;;  %v406_v42 = vld [vmem:[%s643_s2 + $0x28] sm:$0xff]   ;;  %v405_v58 = vld [vmem:[%s643_s2 + $0x20] sm:$0xff]  }
   0xe   :  { %v357_v41 = vunpack.c.l.bf16 %v400_v38  ;;  %v358_v46 = vunpack.c.h.bf16 %v400_v38  ;;  %v385_v47 = vunpack.c.l.bf16 %v406_v42  ;;  %v386_v50 = vunpack.c.h.bf16 %v406_v42  ;;  %v399_v54 = vld [vmem:[%s642_s1 + $0x28] sm:$0xff]  }
   0xf   :  { %v353_v60 = vunpack.c.l.bf16 %v399_v54  ;;  %v354_v61 = vunpack.c.h.bf16 %v399_v54  ;;  %v382_v63 = vunpack.c.h.bf16 %v405_v58  ;;  %v381_v0 = vunpack.c.l.bf16 %v405_v58  ;;  %v364_v58 = vld [vmem:[%s643_s2] sm:$0xff]  }
  0x10   :  { %140 = vperm.xlu0 %416, %v61_v4  }
  0x11   :  { %130 = vperm.xlu1 %417, %v59_v5   ;;  %120 = vperm.xlu2 %418, %v57_v6   ;;  %v398_v5 = vld [vmem:[%s642_s1 + $0x20] sm:$0xff]  }
  0x12   :  { %v349_v6 = vunpack.c.l.bf16 %v398_v5 }
  0x18   :  { %105 = vperm.xlu0 %416, %v54_v8  }
  0x19   :  { %110 = vperm.xlu1 %417, %v55_v7   ;;  %95 = vperm.xlu2 %418, %v52_v9  }
  0x20   :  { %100 = vperm.xlu0 %416, %v53_v10   ;;  %v350_v10 = vunpack.c.h.bf16 %v398_v5 }
  0x21   :  { %85 = vperm.xlu1 %417, %v50_v11   ;;  %90 = vperm.xlu2 %418, %v51_v12   ;;  %v404_v12 = vld [vmem:[%s643_s2 + $0x18] sm:$0xff]  }
  0x28   :  { %75 = vperm.xlu0 %416, %v48_v14   ;;  %v378_v14 = vunpack.c.h.bf16 %v404_v12 }
  0x29   :  { %80 = vperm.xlu1 %417, %v49_v13   ;;  %65 = vperm.xlu2 %418, %v46_v15  }
  0x30   :  { %70 = vperm.xlu0 %416, %v47_v16  }
  0x63   :  { %v116_v24 = vpop.permute.xlu2 %115 }
  0x64   :  { %v156_v48 = vmul.f32 %v569_v19, %v116_v24 }
  0x66   :  { %v236_v55 = vmul.f32 %v385_v47, %v156_v48 }
  0x68   :  { %v252_v3 = vadd.f32 %v353_v60, %v236_v55  ;;  %v366_v60 = vunpack.c.h.bf16 %v364_v58 }
  0x6b   :  { %v121_v49 = vpop.permute.xlu2 %120 }
  0x6c   :  { %v157_v51 = vmul.f32 %v569_v19, %v121_v49 }
  0x6e   :  { %v237_v57 = vmul.f32 %v386_v50, %v157_v51  ;;  %v395_v50 = vld [vmem:[%s642_s1 + $0x8] sm:$0xff]  }
  0x70   :  { %v253_v4 = vadd.f32 %v354_v61, %v237_v57 }
  0x72   :  { %v263_v9 = vpack.c.bf16 %v253_v4, %v252_v3 }
  0x73   :  { %v96_v13 = vpop.permute.xlu2 %95 }
  0x74   :  { %v152_v20 = vmul.f32 %v569_v19, %v96_v13 }
  0x7a   :  { %v136_v17 = vpop.permute.xlu0 %135 }
  0x7b   :  { %v126_v18 = vpop.permute.xlu1 %125  ;;  %v160_v22 = vmul.f32 %v569_v19, %v136_v17 }
  0x7c   :  { %v158_v34 = vmul.f32 %v569_v19, %v126_v18  ;;  %v377_v18 = vunpack.c.l.bf16 %v404_v12 }
  0x7d   :  { %v240_v29 = vmul.f32 %v393_v21, %v160_v22  ;;  %v397_v22 = vld [vmem:[%s642_s1 + $0x18] sm:$0xff]  }
  0x7e   :  { %v238_v43 = vmul.f32 %v389_v33, %v158_v34  ;;  %v346_v25 = vunpack.c.h.bf16 %v397_v22 }
  0x7f   :  { %v256_v39 = vadd.f32 %v361_v31, %v240_v29 }
  0x80   :  { %v254_v52 = vadd.f32 %v357_v41, %v238_v43 }
  0x82   :  { %v141_v27 = vpop.permute.xlu0 %140 }
  0x83   :  { %v131_v28 = vpop.permute.xlu1 %130  ;;  %v161_v30 = vmul.f32 %v569_v19, %v141_v27  ;;  %v345_v27 = vunpack.c.l.bf16 %v397_v22 }
  0x84   :  { %v159_v37 = vmul.f32 %v569_v19, %v131_v28  ;;  %v403_v28 = vld [vmem:[%s643_s2 + $0x10] sm:$0xff]  }
  0x85   :  { %v241_v35 = vmul.f32 %v394_v26, %v161_v30  ;;  %v232_v26 = vmul.f32 %v377_v18, %v152_v20  ;;  %v373_v29 = vunpack.c.l.bf16 %v403_v28  ;;  %v374_v33 = vunpack.c.h.bf16 %v403_v28 }
  0x86   :  { %v239_v44 = vmul.f32 %v390_v36, %v159_v37  ;;  %v396_v37 = vld [vmem:[%s642_s1 + $0x10] sm:$0xff]  }
  0x87   :  { %v257_v40 = vadd.f32 %v362_v32, %v241_v35  ;;  %v91_v32 = vpop.permute.xlu2 %90  ;;  %v248_v35 = vadd.f32 %v345_v27, %v232_v26  ;;  %v341_v41 = vunpack.c.l.bf16 %v396_v37 }
  0x88   :  { %v255_v53 = vadd.f32 %v358_v46, %v239_v44  ;;  %v151_v34 = vmul.f32 %v569_v19, %v91_v32  ;;  %v342_v44 = vunpack.c.h.bf16 %v396_v37 }
  0x89   :  { %v265_v45 = vpack.c.bf16 %v257_v40, %v256_v39  ;;  %v402_v39 = vld [vmem:[%s643_s2 + $0x8] sm:$0xff]  }
  0x8a   :  { %v106_v56 = vpop.permute.xlu0 %105  ;;  %v264_v59 = vpack.c.bf16 %v255_v53, %v254_v52  ;;  %v231_v43 = vmul.f32 %v374_v33, %v151_v34  ;;  %v369_v47 = vunpack.c.l.bf16 %v402_v39  ;;  %v337_v52 = vunpack.c.l.bf16 %v395_v50 }
  0x8b   :  { %276 = vmatpush.bf16.xpose.msra.mxu0 %v265_v45  ;;  %v111_v62 = vpop.permute.xlu1 %110  ;;  %v154_v2 = vmul.f32 %v569_v19, %v106_v56  ;;  %v370_v45 = vunpack.c.h.bf16 %v402_v39  ;;  %v338_v56 = vunpack.c.h.bf16 %v395_v50 }
  0x8c   :  { %v155_v1 = vmul.f32 %v569_v19, %v111_v62  ;;  %v247_v51 = vadd.f32 %v342_v44, %v231_v43 }
  0x8d   :  { %v234_v8 = vmul.f32 %v381_v0, %v154_v2  ;;  %v365_v0 = vunpack.c.l.bf16 %v364_v58  ;;  %v332_v2 = vld [vmem:[%s642_s1] sm:$0xff]   ;;  %s477_s1 = smov [#allocation6]  }
  0x8e   :  { %v235_v7 = vmul.f32 %v382_v63, %v155_v1  ;;  %v334_v5 = vunpack.c.h.bf16 %v332_v2  ;;  %s311_s4 = sshll.u32 %s477_s1, 4  ;;  %s312_s4 = int_to_ptr.vmem [resolvable:$true] %s311_s4 }
  0x8f   :  { %v250_v16 = vadd.f32 %v349_v6, %v234_v8 }
  0x90   :  { %v251_v17 = vadd.f32 %v350_v10, %v235_v7  ;;  %v333_v7 = vunpack.c.l.bf16 %v332_v2 }
  0x92   :  { %v101_v11 = vpop.permute.xlu0 %100  ;;  %v262_v24 = vpack.c.bf16 %v251_v17, %v250_v16 }
  0x93   :  { %277 = vmatpush.bf16.xpose.msra.mxu0 %v264_v59  ;;  %v153_v15 = vmul.f32 %v569_v19, %v101_v11  ;;  %v86_v21 = vpop.permute.xlu1 %85  ;;  %v66_v59 = vpop.permute.xlu2 %65  ;;  %v330_v11 = vld [vmem:[#allocation3] sm:$0xff] }
  0x94   :  { %v150_v30 = vmul.f32 %v569_v19, %v86_v21  ;;  %v146_v1 = vmul.f32 %v569_v19, %v66_v59 }
  0x95   :  { %v233_v23 = vmul.f32 %v378_v14, %v153_v15 }
  0x96   :  { %v230_v38 = vmul.f32 %v373_v29, %v150_v30  ;;  %v226_v6 = vmul.f32 %v365_v0, %v146_v1 }
  0x97   :  { %v249_v31 = vadd.f32 %v346_v25, %v233_v23 }
  0x98   :  { %v246_v49 = vadd.f32 %v341_v41, %v230_v38 }
  0x99   :  { %v261_v40 = vpack.c.bf16 %v249_v31, %v248_v35 }
  0x9a   :  { %v76_v36 = vpop.permute.xlu0 %75  ;;  %v260_v55 = vpack.c.bf16 %v247_v51, %v246_v49 }
  0x9b   :  { %278 = vmatpush.bf16.xpose.msra.mxu0 %v263_v9  ;;  %v81_v42 = vpop.permute.xlu1 %80  ;;  %v148_v48 = vmul.f32 %v569_v19, %v76_v36  ;;  %v242_v9 = vadd.f32 %v333_v7, %v226_v6 }
  0x9c   :  { %v149_v46 = vmul.f32 %v569_v19, %v81_v42 }
  0x9d   :  { %v228_v54 = vmul.f32 %v369_v47, %v148_v48 }
  0x9e   :  { %v229_v53 = vmul.f32 %v370_v45, %v149_v46 }
  0x9f   :  { %v244_v62 = vadd.f32 %v337_v52, %v228_v54 }
  0xa0   :  { %v245_v63 = vadd.f32 %v338_v56, %v229_v53 }
  0xa2   :  { %v71_v57 = vpop.permute.xlu0 %70  ;;  %v259_v4 = vpack.c.bf16 %v245_v63, %v244_v62 }
  0xa3   :  { %279 = vmatpush.bf16.xpose.msra.mxu0 %v262_v24  ;;  %v147_v61 = vmul.f32 %v569_v19, %v71_v57  ;;  %v420_v19 = vld [vmem:[%s646_s5] ss:$0 sm:$0xff] }
  0xa5   :  { %v227_v3 = vmul.f32 %v366_v60, %v147_v61 }
  0xa7   :  { %v243_v8 = vadd.f32 %v334_v5, %v227_v3 }
  0xa9   :  { %v258_v10 = vpack.c.bf16 %v243_v8, %v242_v9 }
  0xab   :  { %280 = vmatpush.bf16.xpose.msra.mxu0 %v261_v40 }
  0xb3   :  { %281 = vmatpush.bf16.xpose.msra.mxu0 %v260_v55 }
  0xbb   :  { %282 = vmatpush.bf16.xpose.msra.mxu0 %v259_v4 }
  0xc3   :  { %283 = vmatpush.bf16.xpose.msra.mxu0 %v258_v10 }
  0xca   :  { %284 = vmatmul.bf16.vlgmr.msra.gmra.mxu0 %v330_v11 }
 0x147   :  { %v285_v12 = vpop.f32.mrf.mxu0 }
 0x148   :  { %v303_v13 = vadd.f32 %v420_v19, %v285_v12 }
 0x14a   :  { %305 = vst [vmem:[#allocation6] sm:$0xff] %v303_v13 }
 0x14f   :  { %v287_v14 = vpop.f32.mrf.mxu0 }
 0x150   :  { %v304_v15 = vadd.f32 %v420_v19, %v287_v14 }
 0x152   :  { %306 = vst [vmem:[#allocation6 + $0x8] sm:$0xff] %v304_v15 }
 0x153   :  { %319 = dma.vmem_to_hbm [thread:$0]  %s312_s4, 256, %s314_s19, [#allocation5], %s478_s20, %s478_s20, %s479_s21  }
 0x154   :  { %471 = dma.done.wait [#allocation5], 256  }
 0x155   :  { %472 = vsyncadd [#allocation5], 4294967040 }
 0x156   :  { %324 = vsyncpa [#allocation4], 1 }
 0x157   :  { %325 = vsyncpa [#allocation5], 1 }

</bundles_post_ra>
